<compile_context>
chip_gen: v7x
topology: tpu7x:2x2x1
jax: 0.10.0
libtpu: 0.0.40
codegen_flags: <defaults>
</compile_context>

<pallas_src>
import functools
import math

import jax
import jax.numpy as jnp
from jax.experimental import pallas as pl
from jax.experimental.pallas import tpu as pltpu


# ----------------------------- Pallas kernel --------------------------------
def _mlp_critic_kernel(xt_ref, w1_ref, w2_ref, vec_ref, out_ref, *, h_valid):
    """One batch tile (lane axis) per grid step; weights stay resident in VMEM.

    xt_ref : (D_pad, bt)      bf16   input, features on sublanes, batch on lanes
    w1_ref : (H_pad, D_pad)   bf16   fc1 weight (PyTorch layout)
    w2_ref : (H_pad, H_pad)   bf16   fc2 weight (PyTorch layout)
    vec_ref: (H_pad, 8)       f32    packed column vectors:
             col 0 = b1, 1 = ln_gamma, 2 = ln_beta, 3 = b2, 4 = w3, 5 = [b3,0..]
    out_ref: (1, 1, bt)       f32    lane-dense value output for this tile
    """
    x = xt_ref[...]                                   # (D_pad, bt) bf16

    b1 = vec_ref[:, 0:1]                              # (H_pad, 1) f32
    ln_g = vec_ref[:, 1:2]
    ln_b = vec_ref[:, 2:3]
    b2 = vec_ref[:, 3:4]
    w3 = vec_ref[:, 4:5]
    b3 = vec_ref[0:1, 5:6]                            # (1, 1)

    # fc1 + ReLU  (MXU: bf16 in, f32 accumulate)
    h1 = jnp.dot(w1_ref[...], x, preferred_element_type=jnp.float32) + b1
    h1 = jnp.maximum(h1, 0.0)                         # (H_pad, bt) f32

    # LayerNorm over the feature (sublane) axis — fused single-pass statistics.
    # Padded feature rows of h1 are exactly zero, so dividing the padded-axis
    # sums by the *valid* feature count reproduces PyTorch LayerNorm exactly
    # (biased variance, eps = 1e-5).
    inv_h = 1.0 / h_valid
    s1 = jnp.sum(h1, axis=0, keepdims=True)           # (1, bt)
    s2 = jnp.sum(h1 * h1, axis=0, keepdims=True)      # (1, bt)
    mean = s1 * inv_h
    var = jnp.maximum(s2 * inv_h - mean * mean, 0.0)
    hn = (h1 - mean) * jax.lax.rsqrt(var + 1e-5) * ln_g + ln_b

    # fc2 + ReLU  (MXU: bf16 in, f32 accumulate)
    h2 = jnp.dot(w2_ref[...], hn.astype(w2_ref.dtype),
                 preferred_element_type=jnp.float32) + b2
    h2 = jnp.maximum(h2, 0.0)                         # (H_pad, bt) f32

    # fc3 (out_features = 1): VPU multiply + sublane reduce instead of a
    # degenerate N=1 MXU matmul; result is already lane-dense (1, bt).
    v = jnp.sum(h2 * w3, axis=0, keepdims=True) + b3  # (1, bt)
    out_ref[...] = v.reshape(out_ref.shape).astype(out_ref.dtype)


# ----------------------------- wrapper ---------------------------------------
def _round_up(x, m):
    return ((x + m - 1) // m) * m


def _choose_batch_tile(B, requested):
    # Lane-axis tile: keep it a multiple of 128 and no larger than needed.
    bt = max(128, _round_up(requested, 128))
    bt = min(bt, _round_up(B, 128))
    # v7x has 2 TensorCores: keep at least 2 grid steps when the batch allows
    # it so the "parallel" axis can be sharded across both cores.
    if _round_up(B, bt) // bt < 2 and B > 128:
        bt = max(128, _round_up(pl.cdiv(B, 2), 128))
    return bt


def mlp_critic_forward(inputs, params, *, batch_tile=512,
                       compute_dtype=jnp.bfloat16):
    """inputs: (B, D_in) float32.  params: PyTorch-layout weights/biases."""
    B, D_in = inputs.shape
    H = int(params["w1"].shape[0])                    # fc1 out_features

    D_pad = _round_up(D_in, 128)
    H_pad = _round_up(H, 128)
    bt = _choose_batch_tile(B, batch_tile)
    B_pad = _round_up(B, bt)
    n_tiles = B_pad // bt

    # Pad + transpose once on the XLA side (features on sublanes, batch on lanes).
    xt = jnp.zeros((D_pad, B_pad), compute_dtype).at[:D_in, :B].set(
        inputs.T.astype(compute_dtype))
    w1 = jnp.zeros((H_pad, D_pad), compute_dtype).at[:H, :D_in].set(
        params["w1"].astype(compute_dtype))
    w2 = jnp.zeros((H_pad, H_pad), compute_dtype).at[:H, :H].set(
        params["w2"].astype(compute_dtype))

    # Pack all per-feature vectors + the fc3 bias scalar into one small array.
    vecs = jnp.zeros((H_pad, 8), jnp.float32)
    vecs = vecs.at[:H, 0].set(params["b1"])
    vecs = vecs.at[:H, 1].set(params["ln_g"])
    vecs = vecs.at[:H, 2].set(params["ln_b"])
    vecs = vecs.at[:H, 3].set(params["b2"])
    vecs = vecs.at[:H, 4].set(params["w3"])
    vecs = vecs.at[0, 5].set(params["b3"])

    kernel = functools.partial(_mlp_critic_kernel, h_valid=float(H))

    # VMEM footprint per step is a few 100 KB even at bt=1024 / H_pad=128,
    # comfortably under the 32 MiB scoped default on v7x.
    out = pl.pallas_call(
        kernel,
        out_shape=jax.ShapeDtypeStruct((n_tiles, 1, bt), jnp.float32),
        grid_spec=pltpu.PrefetchScalarGridSpec(
            num_scalar_prefetch=0,
            grid=(n_tiles,),
            in_specs=[
                pl.BlockSpec((D_pad, bt), lambda i: (0, i)),      # x (transposed)
                pl.BlockSpec((H_pad, D_pad), lambda i: (0, 0)),   # w1 (resident)
                pl.BlockSpec((H_pad, H_pad), lambda i: (0, 0)),   # w2 (resident)
                pl.BlockSpec((H_pad, 8), lambda i: (0, 0)),       # packed vectors
            ],
            out_specs=pl.BlockSpec((1, 1, bt), lambda i: (i, 0, 0)),
        ),
        compiler_params=pltpu.CompilerParams(
            dimension_semantics=("parallel",)),
    )(xt, w1, w2, vecs)

    # (n_tiles, 1, bt) flattens in batch order -> (B_pad, 1); drop the padding.
    return out.reshape(B_pad, 1)[:B]


# ----------------------------- glue / init ----------------------------------
def build_inputs(obs, actions, states):
    """BaseCritic._build_inputs: concat flattened obs, actions, states along -1."""
    b = obs.shape[0]
    return jnp.concatenate(
        [obs.reshape(b, -1), actions.reshape(b, -1), states.reshape(b, -1)], axis=-1)


def init_params(key, d_in, hidden, gain=0.01):
    k1, k2, k3, k4 = jax.random.split(key, 4)
    ortho = jax.nn.initializers.orthogonal
    # PyTorch nn.Linear weight layout: (out_features, in_features).
    w1 = ortho(scale=math.sqrt(2.0))(k1, (hidden, d_in), jnp.float32)   # orthogonal_init_(fc1)
    w2 = ortho(scale=gain)(k2, (hidden, hidden), jnp.float32)           # orthogonal_init_(fc2, gain)
    lim = 1.0 / math.sqrt(hidden)
    w3 = jax.random.uniform(k3, (hidden,), jnp.float32, -lim, lim)      # fc3.weight (1,H) -> (H,)
    b3 = jax.random.uniform(k4, (), jnp.float32, -lim, lim)             # fc3.bias
    return {
        "w1": w1, "b1": jnp.zeros((hidden,), jnp.float32),
        "w2": w2, "b2": jnp.zeros((hidden,), jnp.float32),
        "w3": w3, "b3": b3,
        "ln_g": jnp.ones((hidden,), jnp.float32),    # nn.LayerNorm weight
        "ln_b": jnp.zeros((hidden,), jnp.float32),   # nn.LayerNorm bias
    }


def reference_forward(inputs, p, compute_dtype=jnp.bfloat16):
    """Pure-JAX reference with the same bf16-in / f32-accumulate matmul policy."""
    x = inputs.astype(compute_dtype)
    h1 = jnp.dot(x, p["w1"].T.astype(compute_dtype),
                 preferred_element_type=jnp.float32) + p["b1"]
    h1 = jnp.maximum(h1, 0.0)
    mean = jnp.mean(h1, axis=-1, keepdims=True)
    var = jnp.mean((h1 - mean) ** 2, axis=-1, keepdims=True)
    hn = (h1 - mean) * jax.lax.rsqrt(var + 1e-5) * p["ln_g"] + p["ln_b"]
    h2 = jnp.dot(hn.astype(compute_dtype), p["w2"].T.astype(compute_dtype),
                 preferred_element_type=jnp.float32) + p["b2"]
    h2 = jnp.maximum(h2, 0.0)
    return jnp.dot(h2, p["w3"][:, None]) + p["b3"]


if __name__ == "__main__":
    # Small synthetic "args": n_agents=3, obs_shape=10, n_actions=5, state_shape=12,
    # critic_inputs includes 'state', hidden_dim=32, use_layer_norm=True, gain=0.01.
    B, n_agents, obs_shape, n_actions, state_shape, hidden = 8, 3, 10, 5, 12, 32
    d_in = obs_shape * n_agents + n_actions * n_agents + state_shape  # 57

    key = jax.random.PRNGKey(0)
    k_obs, k_act, k_st, k_par = jax.random.split(key, 4)
    obs = jax.random.normal(k_obs, (B, n_agents, obs_shape), jnp.float32)
    actions = jax.random.normal(k_act, (B, n_agents, n_actions), jnp.float32)
    states = jax.random.normal(k_st, (B, state_shape), jnp.float32)

    params = init_params(k_par, d_in, hidden, gain=0.01)
    inputs = build_inputs(obs, actions, states)

    v = mlp_critic_forward(inputs, params, batch_tile=512)
    v = jax.block_until_ready(v)

    v_ref = reference_forward(inputs, params)
    assert v.shape == (B, 1)
    assert jnp.allclose(v, v_ref, atol=2e-3, rtol=2e-3), "mismatch vs reference"
    # The module's forward returns (v, None); the second element carries no compute.
    print("KERNEL_OK")
</pallas_src>

<mosaic_0001>
module attributes {stable_mosaic.version = 11 : i64} {
  func.func @_mlp_critic_kernel(%arg0: i32, %arg1: memref<128x128xbf16, #tpu.memory_space<vmem>>, %arg2: memref<128x128xbf16, #tpu.memory_space<vmem>>, %arg3: memref<128x128xbf16, #tpu.memory_space<vmem>>, %arg4: memref<128x8xf32, #tpu.memory_space<vmem>>, %arg5: memref<1x1x128xf32, #tpu.memory_space<vmem>>) attributes {dimension_semantics = [#tpu.dimension_semantics<parallel>], iteration_bounds = array<i64: 1>, scalar_prefetch = 0 : i64, scratch_operands = 0 : i64, tpu.core_type = #tpu.core_type<tc>, window_params = [{transform_indices = @transform_0, window_bounds = array<i64: 128, 128>}, {pipeline_mode = #tpu.pipeline_mode<synchronous>, transform_indices = @transform_1, window_bounds = array<i64: 128, 128>}, {pipeline_mode = #tpu.pipeline_mode<synchronous>, transform_indices = @transform_2, window_bounds = array<i64: 128, 128>}, {pipeline_mode = #tpu.pipeline_mode<synchronous>, transform_indices = @transform_3, window_bounds = array<i64: 128, 8>}, {transform_indices = @transform_4, window_bounds = array<i64: 1, 1, 128>}]} {
    %c0 = arith.constant 0 : index
    %c0_0 = arith.constant 0 : index
    %0 = vector.load %arg1[%c0, %c0_0] : memref<128x128xbf16, #tpu.memory_space<vmem>>, vector<128x128xbf16>
    %c0_1 = arith.constant 0 : index
    %c0_2 = arith.constant 0 : index
    %1 = vector.load %arg4[%c0_1, %c0_2] : memref<128x8xf32, #tpu.memory_space<vmem>>, vector<128x1xf32>
    %c0_3 = arith.constant 0 : index
    %c1 = arith.constant 1 : index
    %2 = vector.load %arg4[%c0_3, %c1] : memref<128x8xf32, #tpu.memory_space<vmem>>, vector<128x1xf32>
    %c0_4 = arith.constant 0 : index
    %c2 = arith.constant 2 : index
    %3 = vector.load %arg4[%c0_4, %c2] : memref<128x8xf32, #tpu.memory_space<vmem>>, vector<128x1xf32>
    %c0_5 = arith.constant 0 : index
    %c3 = arith.constant 3 : index
    %4 = vector.load %arg4[%c0_5, %c3] : memref<128x8xf32, #tpu.memory_space<vmem>>, vector<128x1xf32>
    %c0_6 = arith.constant 0 : index
    %c4 = arith.constant 4 : index
    %5 = vector.load %arg4[%c0_6, %c4] : memref<128x8xf32, #tpu.memory_space<vmem>>, vector<128x1xf32>
    %c0_7 = arith.constant 0 : index
    %c5 = arith.constant 5 : index
    %6 = vector.load %arg4[%c0_7, %c5] : memref<128x8xf32, #tpu.memory_space<vmem>>, vector<1x1xf32>
    %c0_8 = arith.constant 0 : index
    %c0_9 = arith.constant 0 : index
    %7 = vector.load %arg2[%c0_8, %c0_9] : memref<128x128xbf16, #tpu.memory_space<vmem>>, vector<128x128xbf16>
    %cst = arith.constant dense<0.000000e+00> : vector<128x128xf32>
    %8 = tpu.matmul %7, %0, %cst {dimension_numbers = #tpu.dot_dimension_numbers<[1], [0], [0], [1], [0, 0, 1, 1], [], []>} : vector<128x128xbf16>, vector<128x128xbf16>, vector<128x128xf32> -> vector<128x128xf32>
    %9 = vector.broadcast %1 : vector<128x1xf32> to vector<128x128xf32>
    %10 = arith.addf %8, %9 : vector<128x128xf32>
    %cst_10 = arith.constant 0.000000e+00 : f32
    %11 = vector.broadcast %cst_10 : f32 to vector<128x128xf32>
    %12 = arith.maximumf %10, %11 : vector<128x128xf32>
    %cst_11 = arith.constant dense<0.000000e+00> : vector<128xf32>
    %13 = vector.multi_reduction <add>, %12, %cst_11 [0] : vector<128x128xf32> to vector<128xf32>
    %14 = vector.shape_cast %13 : vector<128xf32> to vector<1x128xf32>
    %15 = arith.mulf %12, %12 : vector<128x128xf32>
    %cst_12 = arith.constant dense<0.000000e+00> : vector<128xf32>
    %16 = vector.multi_reduction <add>, %15, %cst_12 [0] : vector<128x128xf32> to vector<128xf32>
    %17 = vector.shape_cast %16 : vector<128xf32> to vector<1x128xf32>
    %cst_13 = arith.constant 3.125000e-02 : f32
    %18 = vector.broadcast %cst_13 : f32 to vector<1x128xf32>
    %19 = arith.mulf %14, %18 : vector<1x128xf32>
    %cst_14 = arith.constant 3.125000e-02 : f32
    %20 = vector.broadcast %cst_14 : f32 to vector<1x128xf32>
    %21 = arith.mulf %17, %20 : vector<1x128xf32>
    %22 = arith.mulf %19, %19 : vector<1x128xf32>
    %23 = arith.subf %21, %22 : vector<1x128xf32>
    %cst_15 = arith.constant 0.000000e+00 : f32
    %24 = vector.broadcast %cst_15 : f32 to vector<1x128xf32>
    %25 = arith.maximumf %23, %24 : vector<1x128xf32>
    %26 = vector.broadcast %19 : vector<1x128xf32> to vector<128x128xf32>
    %27 = arith.subf %12, %26 : vector<128x128xf32>
    %cst_16 = arith.constant 9.99999974E-6 : f32
    %28 = vector.broadcast %cst_16 : f32 to vector<1x128xf32>
    %29 = arith.addf %25, %28 : vector<1x128xf32>
    %30 = math.rsqrt %29 : vector<1x128xf32>
    %31 = vector.broadcast %30 : vector<1x128xf32> to vector<128x128xf32>
    %32 = arith.mulf %27, %31 : vector<128x128xf32>
    %33 = vector.broadcast %2 : vector<128x1xf32> to vector<128x128xf32>
    %34 = arith.mulf %32, %33 : vector<128x128xf32>
    %35 = vector.broadcast %3 : vector<128x1xf32> to vector<128x128xf32>
    %36 = arith.addf %34, %35 : vector<128x128xf32>
    %c0_17 = arith.constant 0 : index
    %c0_18 = arith.constant 0 : index
    %37 = vector.load %arg3[%c0_17, %c0_18] : memref<128x128xbf16, #tpu.memory_space<vmem>>, vector<128x128xbf16>
    %38 = arith.truncf %36 : vector<128x128xf32> to vector<128x128xbf16>
    %cst_19 = arith.constant dense<0.000000e+00> : vector<128x128xf32>
    %39 = tpu.matmul %37, %38, %cst_19 {dimension_numbers = #tpu.dot_dimension_numbers<[1], [0], [0], [1], [0, 0, 1, 1], [], []>} : vector<128x128xbf16>, vector<128x128xbf16>, vector<128x128xf32> -> vector<128x128xf32>
    %40 = vector.broadcast %4 : vector<128x1xf32> to vector<128x128xf32>
    %41 = arith.addf %39, %40 : vector<128x128xf32>
    %cst_20 = arith.constant 0.000000e+00 : f32
    %42 = vector.broadcast %cst_20 : f32 to vector<128x128xf32>
    %43 = arith.maximumf %41, %42 : vector<128x128xf32>
    %44 = vector.broadcast %5 : vector<128x1xf32> to vector<128x128xf32>
    %45 = arith.mulf %43, %44 : vector<128x128xf32>
    %cst_21 = arith.constant dense<0.000000e+00> : vector<128xf32>
    %46 = vector.multi_reduction <add>, %45, %cst_21 [0] : vector<128x128xf32> to vector<128xf32>
    %47 = vector.shape_cast %46 : vector<128xf32> to vector<1x128xf32>
    %48 = vector.broadcast %6 : vector<1x1xf32> to vector<1x128xf32>
    %49 = arith.addf %47, %48 : vector<1x128xf32>
    %50 = vector.shape_cast %49 : vector<1x128xf32> to vector<1x1x128xf32>
    %c0_22 = arith.constant 0 : index
    %c0_23 = arith.constant 0 : index
    %c0_24 = arith.constant 0 : index
    %51 = vector.load %arg5[%c0_22, %c0_23, %c0_24] : memref<1x1x128xf32, #tpu.memory_space<vmem>>, vector<1x1x128xf32>
    tpu.vector_store %arg5[%c0_22, %c0_23, %c0_24], %50 {strides = array<i32>} : memref<1x1x128xf32, #tpu.memory_space<vmem>>, vector<1x1x128xf32>,
    return
  }
  func.func @transform_0(%arg0: i32) -> (i32, i32) {
    %c0_i32 = arith.constant 0 : i32
    %c0_i32_0 = arith.constant 0 : i32
    return %c0_i32, %arg0 : i32, i32
  }
  func.func @transform_1(%arg0: i32) -> (i32, i32) {
    %c0_i32 = arith.constant 0 : i32
    %c0_i32_0 = arith.constant 0 : i32
    %c0_i32_1 = arith.constant 0 : i32
    return %c0_i32, %c0_i32_0 : i32, i32
  }
  func.func @transform_2(%arg0: i32) -> (i32, i32) {
    %c0_i32 = arith.constant 0 : i32
    %c0_i32_0 = arith.constant 0 : i32
    %c0_i32_1 = arith.constant 0 : i32
    return %c0_i32, %c0_i32_0 : i32, i32
  }
  func.func @transform_3(%arg0: i32) -> (i32, i32) {
    %c0_i32 = arith.constant 0 : i32
    %c0_i32_0 = arith.constant 0 : i32
    %c0_i32_1 = arith.constant 0 : i32
    return %c0_i32, %c0_i32_0 : i32, i32
  }
  func.func @transform_4(%arg0: i32) -> (i32, i32, i32) {
    %c0_i32 = arith.constant 0 : i32
    %c0_i32_0 = arith.constant 0 : i32
    %c0_i32_1 = arith.constant 0 : i32
    return %arg0, %c0_i32, %c0_i32_0 : i32, i32, i32
  }
}

</mosaic_0001>

<bundles_post_ra>
// kernel: tpu_custom_call.1
= control target key start
LH: loop header
LB: loop body
LE: loop exit
PB: predicated region body
PF: predicated region fallthrough
CT: control target
= control target key end

     0   :  { %9 = vsyncpa [#allocation3], 0  ;;  %s1739_s0 = inlined_call_operand.vmem [shape: bf16[128,128], index: 0, kind: input, shape index: {}]   ;;  %s1740_s1 = inlined_call_operand.vmem [shape: bf16[128,128], index: 1, kind: input, shape index: {}]   ;;  %s1741_s2 = inlined_call_operand.hbm [shape: bf16[128,128], index: 2, kind: input, shape index: {}]   ;;  %s1742_s3 = inlined_call_operand.vmem [shape: f32[128,8], index: 3, kind: input, shape index: {}]   ;;  %s1743_s4 = inlined_call_operand.hbm [shape: f32[1,1,128], index: 4, kind: output, shape index: {}]  }
   0x1   :  { %10 = vsyncpa [#allocation4], 0  ;;  %s1238_s15 = smov [#allocation2]   ;;  %s1190_s19 = scalar_lea.hbm %s1741_s2, 1024 }
   0x2   :  { %s20_s16 = sshll.u32 %s1238_s15, 4  ;;  %p1191_p0 = scmp.ne.s32.totalorder %s1741_s2, %s1190_s19  ;;  %s21_s16 = int_to_ptr.vmem [resolvable:$true] %s20_s16 }
   0x3   :  { %p1194_p1 = scmp.lt.u32.totalorder %s1190_s19, %s1741_s2 }
   0x5   :  { %p1196_p2 = pnand %p1194_p1, %p1191_p0 }
   0x7   :  { %1199 = shalt.err (!%p1196_p2)
}
   0x8   :  { %s1200_s24 = scalar_lea.vmem %s21_s16, 1024  ;;  %p1205_p4 = scmp.lt.s32.totalorder %s21_s16, %s21_s16 }
   0x9   :  { %p1201_p3 = scmp.ne.s32.totalorder %s21_s16, %s1200_s24  ;;  %p1206_p5 = scmp.lt.s32.totalorder %s1200_s24, %s1200_s24 }
   0xb   :  { %p1207_p6 = por %p1206_p5, %p1205_p4 }
   0xd   :  { %p1208_p7 = pnand %p1207_p6, %p1201_p3 }
   0xf   :  { %1211 = shalt.err (!%p1208_p7)
}
  0x10   :  { %s1239_s25 = smov 64   ;;  %s1240_s26 = smov 4  }
  0x11   :  { %26 = dma.hbm_to_vmem [thread:$0]  %s1741_s2, 1024, %s21_s16, [#allocation3], %s1239_s25, %s1239_s25, %s1240_s26  }
  0x12   :  { %1234 = dma.done.wait [#allocation3], 1024  }
  0x13   :  { %1235 = vsyncadd [#allocation3], 4294966272  ;;  %v1241_v0 = vmov 0   ;;  %v1164_v1 = vld [vmem:[%s1739_s0] sm:$0xff]   ;;  %v1165_v2 = vld [vmem:[%s1739_s0 + $0x8] sm:$0xff]   ;;  %v1242_v32 = vmov 1  }
  0x14   :  { %1131 = vset.pattern.permute.xlu1 %v1241_v0  ;;  %1130 = vset.pattern.permute.xlu0 %v1241_v0  ;;  %v1166_v3 = vld [vmem:[%s1739_s0 + $0x10] sm:$0xff]   ;;  %v1167_v4 = vld [vmem:[%s1739_s0 + $0x18] sm:$0xff]   ;;  %v1172_v5 = vld [vmem:[%s1740_s1] sm:$0xff]   ;;  %v1243_v34 = vmov 2  }
  0x15   :  { %1056 = vmatprep.subr.bf16.mxu0 %v1164_v1  ;;  %1072 = vmatprep.mubr.bf16.mxu0 %v1172_v5  ;;  %v1168_v6 = vld [vmem:[%s1739_s0 + $0x20] sm:$0xff]   ;;  %v1169_v7 = vld [vmem:[%s1739_s0 + $0x28] sm:$0xff]   ;;  %v1309_v8 = vld [vmem:[%s1742_s3 + $0x10] sm:$0xff] }
  0x16   :  { %1057 = vmatpush3.bf16.msra.mxu0 %v1164_v1  ;;  %94 = vperm.xlu1 %1131, %v1309_v8   ;;  %v1315_v9 = vld [vmem:[%s1742_s3 + $0x18] sm:$0xff]  ;;  %v1320_v10 = vld [vmem:[%s1742_s3] sm:$0xff]  ;;  %v1170_v11 = vld [vmem:[%s1739_s0 + $0x30] sm:$0xff]  }
  0x17   :  { %1058 = vmatprep.subr.bf16.mxu0 %v1165_v2  ;;  %84 = vperm.xlu0 %1130, %v1320_v10   ;;  %v1329_v12 = vld [vmem:[%s1742_s3 + $0x8] sm:$0xff]  ;;  %v1171_v14 = vld [vmem:[%s1739_s0 + $0x38] sm:$0xff]   ;;  %v1343_v15 = vld [vmem:[%s1742_s3 + $0x20] sm:$0xff] }
  0x18   :  { %v1335_v13 = vld [vmem:[%s1742_s3 + $0x28] sm:$0xff]  ;;  %v1350_v16 = vld [vmem:[%s1742_s3 + $0x38] sm:$0xff]  ;;  %v1356_v17 = vld [vmem:[%s1742_s3 + $0x30] sm:$0xff] }
  0x19   :  { %v1173_v18 = vld [vmem:[%s1740_s1 + $0x8] sm:$0xff]   ;;  %v1174_v20 = vld [vmem:[%s1740_s1 + $0x10] sm:$0xff]   ;;  %v1374_v21 = vld [vmem:[%s1742_s3 + $0x40] sm:$0xff] }
  0x1a   :  { %1059 = vmatpush3.bf16.msra.mxu0 %v1165_v2  ;;  %99 = vperm.xlu1 %1131, %v1315_v9   ;;  %v1365_v19 = vld [vmem:[%s1742_s3 + $0x48] sm:$0xff]  ;;  %v1380_v22 = vld [vmem:[%s1742_s3 + $0x58] sm:$0xff]  ;;  %v1386_v23 = vld [vmem:[%s1742_s3 + $0x50] sm:$0xff] }
  0x1b   :  { %1060 = vmatprep.subr.bf16.mxu0 %v1166_v3  ;;  %89 = vperm.xlu0 %1130, %v1329_v12   ;;  %v1175_v24 = vld [vmem:[%s1740_s1 + $0x18] sm:$0xff]   ;;  %v1395_v25 = vld [vmem:[%s1742_s3 + $0x68] sm:$0xff]  ;;  %v1176_v26 = vld [vmem:[%s1740_s1 + $0x20] sm:$0xff]  }
  0x1c   :  { %v1404_v27 = vld [vmem:[%s1742_s3 + $0x60] sm:$0xff]  ;;  %v1410_v28 = vld [vmem:[%s1742_s3 + $0x78] sm:$0xff]  ;;  %v1416_v29 = vld [vmem:[%s1742_s3 + $0x70] sm:$0xff] }
  0x1d   :  { %v1177_v30 = vld [vmem:[%s1740_s1 + $0x28] sm:$0xff]   ;;  %v1178_v31 = vld [vmem:[%s1740_s1 + $0x30] sm:$0xff]   ;;  %v1179_v33 = vld [vmem:[%s1740_s1 + $0x38] sm:$0xff]  }
  0x1e   :  { %1061 = vmatpush3.bf16.msra.mxu0 %v1166_v3  ;;  %109 = vperm.xlu1 %1131, %v1335_v13   ;;  %v1180_v49 = vld [vmem:[#allocation2] sm:$0xff]   ;;  %v1744_v3 = vmov 3  }
  0x1f   :  { %1062 = vmatprep.subr.bf16.mxu0 %v1167_v4  ;;  %104 = vperm.xlu0 %1130, %v1343_v15  }
  0x20   :  { %1104 = vmatprep.mubr.bf16.mxu1 %v1180_v49 }
  0x22   :  { %1063 = vmatpush3.bf16.msra.mxu0 %v1167_v4  ;;  %119 = vperm.xlu1 %1131, %v1350_v16  }
  0x23   :  { %1064 = vmatprep.subr.bf16.mxu0 %v1168_v6  ;;  %114 = vperm.xlu0 %1130, %v1356_v17  }
  0x26   :  { %1065 = vmatpush3.bf16.msra.mxu0 %v1168_v6  ;;  %129 = vperm.xlu1 %1131, %v1365_v19  }
  0x27   :  { %1066 = vmatprep.subr.bf16.mxu0 %v1169_v7  ;;  %124 = vperm.xlu0 %1130, %v1374_v21  }
  0x2a   :  { %1067 = vmatpush3.bf16.msra.mxu0 %v1169_v7  ;;  %139 = vperm.xlu1 %1131, %v1380_v22  }
  0x2b   :  { %1068 = vmatprep.subr.bf16.mxu0 %v1170_v11  ;;  %134 = vperm.xlu0 %1130, %v1386_v23  }
  0x2e   :  { %1069 = vmatpush3.bf16.msra.mxu0 %v1170_v11  ;;  %149 = vperm.xlu1 %1131, %v1395_v25  }
  0x2f   :  { %1070 = vmatprep.subr.bf16.mxu0 %v1171_v14  ;;  %144 = vperm.xlu0 %1130, %v1404_v27  }
  0x32   :  { %1071 = vmatpush3.bf16.msra.mxu0 %v1171_v14  ;;  %159 = vperm.xlu1 %1131, %v1410_v28  }
  0x33   :  { %154 = vperm.xlu0 %1130, %v1416_v29  }
  0x35   :  { %1073 = vmatmul.mubr.bf16.vlgmr.msra.gmra.mrb[0].mxu0 %v1173_v18 }
  0x36   :  { %1076 = vmatprep.mubr.bf16.mxu0 %v1174_v20  ;;  %1133 = vset.pattern.permute.xlu1 %v1242_v32 }
  0x37   :  { %473 = vperm.xlu1 %1133, %v1329_v12   ;;  %1132 = vset.pattern.permute.xlu0 %v1242_v32 }
  0x38   :  { %469 = vperm.xlu0 %1132, %v1320_v10  }
  0x3b   :  { %1134 = vset.pattern.permute.xlu1 %v1243_v34 }
  0x3c   :  { %549 = vperm.xlu1 %1134, %v1320_v10   ;;  %485 = vperm.xlu0 %1132, %v1343_v15  }
  0x3d   :  { %1077 = vmatmul.mubr.bf16.gmra.mrb[4].mxu0 %v1175_v24 }
  0x3e   :  { %1080 = vmatprep.mubr.bf16.mxu0 %v1176_v26 }
  0x40   :  { %1135 = vset.pattern.permute.xlu1 %v1242_v32  ;;  %501 = vperm.xlu0 %1132, %v1374_v21  }
  0x41   :  { %477 = vperm.xlu1 %1135, %v1309_v8  }
  0x44   :  { %517 = vperm.xlu0 %1132, %v1404_v27  }
  0x45   :  { %1081 = vmatmul.mubr.bf16.gmra.mrb[8].mxu0 %v1177_v30  ;;  %481 = vperm.xlu1 %1135, %v1315_v9  }
  0x46   :  { %1084 = vmatprep.mubr.bf16.mxu0 %v1178_v31 }
  0x48   :  { %1145 = vset.pattern.permute.xlu0 %v1243_v34 }
  0x49   :  { %1136 = vset.pattern.permute.xlu1 %v1243_v34  ;;  %553 = vperm.xlu0 %1145, %v1329_v12  }
  0x4a   :  { %561 = vperm.xlu1 %1136, %v1315_v9  }
  0x4d   :  { %1085 = vmatmul.mubr.bf16.gmra.mrb[12].mxu0 %v1179_v33  ;;  %557 = vperm.xlu0 %1145, %v1309_v8  }
  0x4e   :  { %1137 = vset.pattern.permute.xlu1 %v1242_v32 }
  0x4f   :  { %489 = vperm.xlu1 %1137, %v1335_v13  }
  0x51   :  { %569 = vperm.xlu0 %1145, %v1335_v13  }
  0x53   :  { %1138 = vset.pattern.permute.xlu1 %v1243_v34 }
  0x54   :  { %565 = vperm.xlu1 %1138, %v1343_v15  }
  0x55   :  { %573 = vperm.xlu0 %1145, %v1356_v17  }
  0x58   :  { %1139 = vset.pattern.permute.xlu1 %v1242_v32 }
  0x59   :  { %493 = vperm.xlu1 %1139, %v1356_v17   ;;  %585 = vperm.xlu0 %1145, %v1365_v19  }
  0x5d   :  { %497 = vperm.xlu1 %1139, %v1350_v16   ;;  %589 = vperm.xlu0 %1145, %v1386_v23  }
  0x61   :  { %1140 = vset.pattern.permute.xlu1 %v1243_v34  ;;  %601 = vperm.xlu0 %1145, %v1395_v25  }
  0x62   :  { %577 = vperm.xlu1 %1140, %v1350_v16  }
  0x65   :  { %605 = vperm.xlu0 %1145, %v1416_v29  }
  0x66   :  { %1141 = vset.pattern.permute.xlu1 %v1242_v32 }
  0x67   :  { %505 = vperm.xlu1 %1141, %v1365_v19  }
  0x6b   :  { %1142 = vset.pattern.permute.xlu1 %v1243_v34 }
  0x6c   :  { %581 = vperm.xlu1 %1142, %v1374_v21  }
  0x70   :  { %1143 = vset.pattern.permute.xlu1 %v1242_v32 }
  0x71   :  { %509 = vperm.xlu1 %1143, %v1386_v23  }
  0x75   :  { %513 = vperm.xlu1 %1143, %v1380_v22  }
  0x79   :  { %1144 = vset.pattern.permute.xlu1 %v1243_v34 }
  0x7a   :  { %593 = vperm.xlu1 %1144, %v1380_v22  }
  0x7e   :  { %1146 = vset.pattern.permute.xlu1 %v1242_v32 }
  0x7f   :  { %521 = vperm.xlu1 %1146, %v1395_v25  }
  0x83   :  { %1147 = vset.pattern.permute.xlu1 %v1243_v34 }
  0x84   :  { %597 = vperm.xlu1 %1147, %v1404_v27  }
  0x88   :  { %1148 = vset.pattern.permute.xlu1 %v1242_v32 }
  0x89   :  { %525 = vperm.xlu1 %1148, %v1416_v29  }
  0x8d   :  { %529 = vperm.xlu1 %1148, %v1410_v28  }
  0x91   :  { %1149 = vset.pattern.permute.xlu1 %v1243_v34 }
  0x92   :  { %609 = vperm.xlu1 %1149, %v1410_v28  }
  0x95   :  { %v95_v35 = vpop.permute.xlu1 %94 }
  0x96   :  { %v85_v44 = vpop.permute.xlu0 %84  ;;  %1150 = vset.pattern.permute.xlu1 %v1744_v3 }
  0x97   :  { %657 = vperm.xlu1 %1150, %v1329_v12  }
  0x99   :  { %v100_v36 = vpop.permute.xlu1 %99 }
  0x9a   :  { %v90_v46 = vpop.permute.xlu0 %89 }
  0x9b   :  { %661 = vperm.xlu1 %1150, %v1309_v8  }
  0x9d   :  { %v110_v37 = vpop.permute.xlu1 %109 }
  0x9e   :  { %v105_v48 = vpop.permute.xlu0 %104 }
  0x9f   :  { %669 = vperm.xlu1 %1150, %v1343_v15  }
  0xa1   :  { %v120_v38 = vpop.permute.xlu1 %119 }
  0xa2   :  { %v115_v51 = vpop.permute.xlu0 %114 }
  0xa5   :  { %v1461_v39 = vpop.permute.xlu1 %129 }
  0xa6   :  { %v125_v53 = vpop.permute.xlu0 %124 }
  0xa9   :  { %v1463_v40 = vpop.permute.xlu1 %139 }
  0xaa   :  { %v135_v55 = vpop.permute.xlu0 %134 }
  0xad   :  { %v1465_v41 = vpop.permute.xlu1 %149 }
  0xae   :  { %v1485_v2 = vpop.permute.xlu0 %144 }
  0xb1   :  { %v1467_v42 = vpop.permute.xlu1 %159 }
  0xb6   :  { %v1469_v43 = vpop.permute.xlu1 %473 }
  0xbb   :  { %v1471_v45 = vpop.permute.xlu1 %549 }
  0xc0   :  { %v1473_v47 = vpop.permute.xlu1 %477 }
  0xc4   :  { %v1475_v50 = vpop.permute.xlu1 %481 }
  0xc9   :  { %v1477_v52 = vpop.permute.xlu1 %561 }
  0xce   :  { %v1479_v54 = vpop.permute.xlu1 %489 }
  0xd3   :  { %v1483_v1 = vpop.permute.xlu1 %565 }
  0xd8   :  { %v1504_v34 = vpop.permute.xlu1 %493 }
 0x108   :  { %v1074_v56 = vpop.f32.mrb[0].mxu0 }
 0x109   :  { %v292_v57 = vpop.f32.mrb[1].mxu0  ;;  %v301_v58 = vadd.f32 %v1074_v56, %v95_v35  ;;  %v155_v35 = vpop.permute.xlu0 %154 }
 0x10a   :  { %v293_v59 = vadd.f32 %v292_v57, %v85_v44  ;;  %v1075_v60 = vpop.f32.mrb[2].mxu0 }
 0x10b   :  { %v304_v61 = vadd.f32 %v1075_v60, %v100_v36  ;;  %v295_v62 = vpop.f32.mrb[3].mxu0  ;;  %v1488_v4 = vmax.f32 %v301_v58, 0.0 }
 0x10c   :  { %v1481_v63 = vmax.f32 %v293_v59, 0.0  ;;  %v296_v0 = vadd.f32 %v295_v62, %v90_v46 }
 0x10d   :  { %v1493_v6 = vmax.f32 %v304_v61, 0.0  ;;  %v394_v26 = vmul.f32 %v1488_v4, %v1488_v4 }
 0x10e   :  { %v1490_v5 = vmax.f32 %v296_v0, 0.0  ;;  %v392_v7 = vmul.f32 %v1481_v63, %v1481_v63  ;;  %v1523_v0 = vpop.permute.xlu0 %469 }
 0x10f   :  { %v395_v36 = vmul.f32 %v1493_v6, %v1493_v6 }
 0x110   :  { %v371_v11 = vadd.f32 %v1490_v5, %v1481_v63  ;;  %v393_v14 = vmul.f32 %v1490_v5, %v1490_v5  ;;  %v1078_v18 = vpop.f32.mrb[4].mxu0 }
 0x111   :  { %v317_v20 = vadd.f32 %v1078_v18, %v115_v51  ;;  %v308_v24 = vpop.f32.mrb[5].mxu0  ;;  %v1529_v18 = vpop.permute.xlu1 %497 }
 0x112   :  { %v372_v30 = vadd.f32 %v371_v11, %v1488_v4  ;;  %v408_v31 = vadd.f32 %v393_v14, %v392_v7  ;;  %v309_v32 = vadd.f32 %v308_v24, %v105_v48  ;;  %v1079_v33 = vpop.f32.mrb[6].mxu0 }
 0x113   :  { %v320_v44 = vadd.f32 %v1079_v33, %v120_v38  ;;  %v311_v46 = vpop.f32.mrb[7].mxu0  ;;  %v1512_v58 = vmax.f32 %v317_v20, 0.0  ;;  %v1745_v38 = vmov 4  }
 0x114   :  { %v409_v49 = vadd.f32 %v408_v31, %v394_v26  ;;  %v1509_v51 = vmax.f32 %v309_v32, 0.0  ;;  %v373_v56 = vadd.f32 %v372_v30, %v1493_v6  ;;  %v312_v57 = vadd.f32 %v311_v46, %v110_v37  ;;  %1151 = vset.pattern.permute.xlu0 %v1745_v38  ;;  %1152 = vset.pattern.permute.xlu1 %v1745_v38 }
 0x115   :  { %v1521_v62 = vmax.f32 %v320_v44, 0.0  ;;  %878 = vperm.xlu0 %1151, %v1320_v10   ;;  %v398_v26 = vmul.f32 %v1512_v58, %v1512_v58  ;;  %882 = vperm.xlu1 %1152, %v1329_v12  }
 0x116   :  { %v374_v48 = vadd.f32 %v373_v56, %v1509_v51  ;;  %v396_v59 = vmul.f32 %v1509_v51, %v1509_v51  ;;  %v410_v60 = vadd.f32 %v409_v49, %v395_v36  ;;  %v1517_v61 = vmax.f32 %v312_v57, 0.0 }
 0x117   :  { %v399_v36 = vmul.f32 %v1521_v62, %v1521_v62 }
 0x118   :  { %v411_v37 = vadd.f32 %v410_v60, %v396_v59  ;;  %v375_v7 = vadd.f32 %v374_v48, %v1517_v61  ;;  %v397_v11 = vmul.f32 %v1517_v61, %v1517_v61  ;;  %v1082_v14 = vpop.f32.mrb[8].mxu0  ;;  %v1546_v48 = vpop.permute.xlu0 %485 }
 0x119   :  { %v333_v20 = vadd.f32 %v1082_v14, %v135_v55  ;;  %v324_v24 = vpop.f32.mrb[9].mxu0  ;;  %894 = vperm.xlu0 %1151, %v1343_v15   ;;  %v1553_v15 = vpop.permute.xlu1 %577  ;;  %886 = vperm.xlu1 %1152, %v1309_v8  }
 0x11a   :  { %v376_v30 = vadd.f32 %v375_v7, %v1512_v58  ;;  %v412_v31 = vadd.f32 %v411_v37, %v397_v11  ;;  %v325_v32 = vadd.f32 %v324_v24, %v125_v53  ;;  %v1083_v33 = vpop.f32.mrb[10].mxu0 }
 0x11b   :  { %v336_v44 = vadd.f32 %v1083_v33, %v1463_v40  ;;  %v327_v46 = vpop.f32.mrb[11].mxu0  ;;  %v1544_v57 = vmax.f32 %v333_v20, 0.0 }
 0x11c   :  { %v413_v55 = vadd.f32 %v412_v31, %v398_v26  ;;  %v1540_v49 = vmax.f32 %v325_v32, 0.0  ;;  %v377_v56 = vadd.f32 %v376_v30, %v1521_v62  ;;  %v328_v53 = vadd.f32 %v327_v46, %v1461_v39  ;;  %v1569_v46 = vpop.permute.xlu0 %501 }
 0x11d   :  { %v1555_v37 = vmax.f32 %v336_v44, 0.0  ;;  %906 = vperm.xlu0 %1151, %v1350_v16   ;;  %v402_v26 = vmul.f32 %v1544_v57, %v1544_v57  ;;  %890 = vperm.xlu1 %1152, %v1315_v9  }
 0x11e   :  { %v378_v59 = vadd.f32 %v377_v56, %v1540_v49  ;;  %v400_v40 = vmul.f32 %v1540_v49, %v1540_v49  ;;  %v414_v60 = vadd.f32 %v413_v55, %v399_v36  ;;  %v1551_v12 = vmax.f32 %v328_v53, 0.0  ;;  %v1577_v53 = vpop.permute.xlu1 %505 }
 0x11f   :  { %v403_v33 = vmul.f32 %v1555_v37, %v1555_v37 }
 0x120   :  { %v415_v39 = vadd.f32 %v414_v60, %v400_v40  ;;  %v379_v7 = vadd.f32 %v378_v59, %v1551_v12  ;;  %v401_v11 = vmul.f32 %v1551_v12, %v1551_v12  ;;  %v1086_v14 = vpop.f32.mrb[12].mxu0 }
 0x121   :  { %v349_v20 = vadd.f32 %v1086_v14, %v155_v35  ;;  %v340_v24 = vpop.f32.mrb[13].mxu0  ;;  %918 = vperm.xlu0 %1151, %v1386_v23   ;;  %1153 = vset.pattern.permute.xlu1 %v1744_v3 }
 0x122   :  { %v380_v30 = vadd.f32 %v379_v7, %v1544_v57  ;;  %v416_v31 = vadd.f32 %v415_v39, %v401_v11  ;;  %v341_v32 = vadd.f32 %v340_v24, %v1485_v2  ;;  %v1087_v8 = vpop.f32.mrb[14].mxu0  ;;  %677 = vperm.xlu1 %1153, %v1356_v17  }
 0x123   :  { %v352_v36 = vadd.f32 %v1087_v8, %v1467_v42  ;;  %v343_v44 = vpop.f32.mrb[15].mxu0  ;;  %v1579_v59 = vmax.f32 %v349_v20, 0.0  ;;  %v1595_v20 = vpop.permute.xlu0 %517 }
 0x124   :  { %v417_v35 = vadd.f32 %v416_v31, %v402_v26  ;;  %v1573_v55 = vmax.f32 %v341_v32, 0.0  ;;  %v381_v56 = vadd.f32 %v380_v30, %v1555_v37  ;;  %v344_v2 = vadd.f32 %v343_v44, %v1465_v41  ;;  %v1600_v31 = vpop.permute.xlu1 %581 }
 0x125   :  { %1158 = vset.pattern.permute.xlu0 %v1744_v3  ;;  %v1588_v11 = vmax.f32 %v352_v36, 0.0  ;;  %v406_v24 = vmul.f32 %v1579_v59, %v1579_v59 }
 0x126   :  { %v382_v42 = vadd.f32 %v381_v56, %v1573_v55  ;;  %v404_v40 = vmul.f32 %v1573_v55, %v1573_v55  ;;  %v418_v60 = vadd.f32 %v417_v35, %v403_v33  ;;  %v1584_v39 = vmax.f32 %v344_v2, 0.0  ;;  %653 = vperm.xlu0 %1158, %v1320_v10   ;;  %681 = vperm.xlu1 %1153, %v1350_v16  }
 0x127   :  { %v407_v32 = vmul.f32 %v1588_v11, %v1588_v11  ;;  %v1607_v44 = vpop.permute.xlu0 %553 }
 0x128   :  { %v419_v7 = vadd.f32 %v418_v60, %v404_v40  ;;  %v383_v41 = vadd.f32 %v382_v42, %v1584_v39  ;;  %v405_v14 = vmul.f32 %v1584_v39, %v1584_v39  ;;  %v1609_v2 = vpop.permute.xlu1 %509 }
 0x12a   :  { %v384_v26 = vadd.f32 %v383_v41, %v1579_v59  ;;  %v420_v30 = vadd.f32 %v419_v7, %v405_v14  ;;  %665 = vperm.xlu0 %1158, %v1315_v9   ;;  %1154 = vset.pattern.permute.xlu1 %v1745_v38 }
 0x12b   :  { %898 = vperm.xlu1 %1154, %v1335_v13   ;;  %v1615_v9 = vpop.permute.xlu0 %557 }
 0x12c   :  { %v385_v8 = vadd.f32 %v384_v26, %v1588_v11  ;;  %v421_v33 = vadd.f32 %v420_v30, %v406_v24  ;;  %v1618_v14 = vpop.permute.xlu1 %513 }
 0x12e   :  { %v386_v10 = vrot.slane %v385_v8, 4  ;;  %v422_v36 = vadd.f32 %v421_v33, %v407_v32  ;;  %673 = vperm.xlu0 %1158, %v1335_v13  }
 0x12f   :  { %902 = vperm.xlu1 %1154, %v1356_v17   ;;  %v1625_v32 = vpop.permute.xlu0 %569 }
 0x130   :  { %v387_v35 = vadd.f32 %v386_v10, %v385_v8  ;;  %v423_v56 = vrot.slane %v422_v36, 4 }
 0x132   :  { %v388_v42 = vrot.slane %v387_v35, 2  ;;  %v424_v40 = vadd.f32 %v423_v56, %v422_v36  ;;  %685 = vperm.xlu0 %1158, %v1374_v21   ;;  %v1633_v36 = vpop.permute.xlu1 %593 }
 0x133   :  { %1155 = vset.pattern.permute.xlu1 %v1744_v3 }
 0x134   :  { %v389_v60 = vadd.f32 %v388_v42, %v387_v35  ;;  %v425_v16 = vrot.slane %v424_v40, 2  ;;  %689 = vperm.xlu1 %1155, %v1365_v19  }
 0x136   :  { %v390_v7 = vrot.slane %v389_v60, 1  ;;  %v426_v41 = vadd.f32 %v425_v16, %v424_v40  ;;  %697 = vperm.xlu0 %1158, %v1380_v22  }
 0x138   :  { %v391_v24 = vadd.f32 %v390_v7, %v389_v60  ;;  %v427_v26 = vrot.slane %v426_v41, 1  ;;  %693 = vperm.xlu1 %1155, %v1386_v23  }
 0x13a   :  { %v428_v13 = vadd.f32 %v427_v26, %v426_v41  ;;  %v1622_v30 = vmul.f32 0.03125, %v391_v24  ;;  %709 = vperm.xlu0 %1158, %v1416_v29  }
 0x13c   :  { %v430_v8 = vmul.f32 0.03125, %v428_v13  ;;  %v431_v17 = vmul.f32 %v1622_v30, %v1622_v30  ;;  %v441_v33 = vsub.f32 %v1521_v62, %v1622_v30  ;;  %v434_v10 = vsub.f32 %v1481_v63, %v1622_v30  ;;  %1156 = vset.pattern.permute.xlu1 %v1745_v38 }
 0x13d   :  { %v438_v35 = vsub.f32 %v1509_v51, %v1622_v30  ;;  %v443_v56 = vsub.f32 %v1551_v12, %v1622_v30  ;;  %v442_v42 = vsub.f32 %v1540_v49, %v1622_v30  ;;  %v446_v40 = vsub.f32 %v1573_v55, %v1622_v30  ;;  %910 = vperm.xlu1 %1156, %v1374_v21  }
 0x13e   :  { %v432_v62 = vsub.f32 %v430_v8, %v431_v17  ;;  %v444_v63 = vsub.f32 %v1544_v57, %v1622_v30  ;;  %v435_v60 = vsub.f32 %v1490_v5, %v1622_v30  ;;  %v445_v16 = vsub.f32 %v1555_v37, %v1622_v30  ;;  %1161 = vset.pattern.permute.xlu0 %v1745_v38 }
 0x13f   :  { %v436_v51 = vsub.f32 %v1488_v4, %v1622_v30  ;;  %v437_v49 = vsub.f32 %v1493_v6, %v1622_v30  ;;  %v439_v12 = vsub.f32 %v1517_v61, %v1622_v30  ;;  %v447_v57 = vsub.f32 %v1584_v39, %v1622_v30  ;;  %v1666_v4 = vpop.permute.xlu0 %573  ;;  %930 = vperm.xlu0 %1161, %v1395_v25   ;;  %v522_v61 = vpop.permute.xlu1 %521 }
 0x140   :  { %v433_v55 = vmax.f32 %v432_v62, 0.0  ;;  %v440_v5 = vsub.f32 %v1512_v58, %v1622_v30  ;;  %v65_v58 = vld [vmem:[%s1742_s3] sm:$0x1]  ;;  %v1246_v39 = vmov 5   ;;  %s1247_s3 = smov [#allocation5]  }
 0x141   :  { %914 = vperm.xlu1 %1156, %v1365_v19   ;;  %s991_s11 = sshll.u32 %s1247_s3, 4  ;;  %s992_s11 = int_to_ptr.vmem [resolvable:$true] %s991_s11 }
 0x142   :  { %v450_v6 = vadd.f32 1e-05, %v433_v55  ;;  %s1212_s12 = scalar_lea.vmem %s992_s11, 16  ;;  %s1216_s13 = scalar_lea.vmem %s992_s11, 32 }
 0x143   :  { %1163 = vset.pattern.permute.xlu0 %v1246_v39  ;;  %v586_v7 = vpop.permute.xlu0 %585  ;;  %v598_v41 = vpop.permute.xlu1 %597  ;;  %p1213_p8 = scmp.ne.s32.totalorder %s992_s11, %s1212_s12  ;;  %p1217_p9 = scmp.lt.s32.totalorder %s992_s11, %s992_s11 }
 0x144   :  { %1188 = vrsqrt.f32 %v450_v6  ;;  %980 = vperm.xlu0 %1163, %v65_v58   ;;  %p1218_p10 = scmp.lt.s32.totalorder %s1216_s13, %s1212_s12 }
 0x145   :  { %1157 = vset.pattern.permute.xlu1 %v1744_v3 }
 0x146   :  { %701 = vperm.xlu1 %1157, %v1404_v27   ;;  %p1219_p11 = por %p1218_p10, %p1217_p9 }
 0x147   :  { %v590_v24 = vpop.permute.xlu0 %589  ;;  %v526_v13 = vpop.permute.xlu1 %525 }
 0x148   :  { %p1220_p12 = pnand %p1219_p11, %p1213_p8 }
 0x14a   :  { %705 = vperm.xlu1 %1157, %v1395_v25  }
 0x14e   :  { %v1189_v26 = vpop.eup %1188 }
 0x14f   :  { %v459_v21 = vmul.f32 %v1189_v26, %v441_v33  ;;  %v452_v8 = vmul.f32 %v1189_v26, %v434_v10  ;;  %v456_v17 = vmul.f32 %v1189_v26, %v438_v35  ;;  %v461_v62 = vmul.f32 %v1189_v26, %v443_v56 }
 0x150   :  { %v460_v55 = vmul.f32 %v1189_v26, %v442_v42  ;;  %v464_v6 = vmul.f32 %v1189_v26, %v446_v40  ;;  %v462_v23 = vmul.f32 %v1189_v26, %v444_v63  ;;  %v453_v39 = vmul.f32 %v1189_v26, %v435_v60  ;;  %v530_v63 = vpop.permute.xlu1 %529 }
 0x151   :  { %v539_v19 = vmul.f32 %v1529_v18, %v459_v21  ;;  %v532_v58 = vmul.f32 %v1523_v0, %v452_v8  ;;  %v536_v3 = vmul.f32 %v1546_v48, %v456_v17  ;;  %v541_v37 = vmul.f32 %v1577_v53, %v461_v62  ;;  %v602_v0 = vpop.permute.xlu0 %601  ;;  %v1186_v17 = vld [vmem:[#allocation2 + $0x30] sm:$0xff]  }
 0x152   :  { %v540_v38 = vmul.f32 %v1569_v46, %v460_v55  ;;  %v544_v33 = vmul.f32 %v1595_v20, %v464_v6  ;;  %v542_v10 = vmul.f32 %v1609_v2, %v462_v23  ;;  %v533_v35 = vmul.f32 %v1469_v43, %v453_v39 }
 0x153   :  { %v612_v56 = vadd.f32 %v1471_v45, %v532_v58  ;;  %v619_v25 = vadd.f32 %v1553_v15, %v539_v19  ;;  %v616_v18 = vadd.f32 %v1483_v1, %v536_v3  ;;  %v463_v42 = vmul.f32 %v1189_v26, %v445_v16 }
 0x154   :  { %v620_v48 = vadd.f32 %v1600_v31, %v540_v38  ;;  %v613_v53 = vadd.f32 %v1607_v44, %v533_v35  ;;  %v454_v40 = vmul.f32 %v1189_v26, %v436_v51  ;;  %v455_v46 = vmul.f32 %v1189_v26, %v437_v49  ;;  %v610_v23 = vpop.permute.xlu1 %609 }
 0x155   :  { %v1747_v20 = vmov 4   ;;  %v543_v2 = vmul.f32 %v1618_v14, %v463_v42  ;;  %v457_v43 = vmul.f32 %v1189_v26, %v439_v12  ;;  %v465_v60 = vmul.f32 %v1189_v26, %v447_v57 }
 0x156   :  { %1159 = vset.pattern.permute.xlu1 %v1747_v20  ;;  %v458_v45 = vmul.f32 %v1189_v26, %v440_v5  ;;  %v534_v1 = vmul.f32 %v1473_v47, %v454_v40  ;;  %v535_v3 = vmul.f32 %v1475_v50, %v455_v46  ;;  %v624_v15 = vadd.f32 %v598_v41, %v544_v33 }
 0x157   :  { %922 = vperm.xlu1 %1159, %v1380_v22   ;;  %v621_v38 = vadd.f32 %v586_v7, %v541_v37  ;;  %v623_v31 = vadd.f32 %v1633_v36, %v543_v2  ;;  %v537_v44 = vmul.f32 %v1479_v54, %v457_v43  ;;  %v545_v16 = vmul.f32 %v522_v61, %v465_v60  ;;  %v606_v37 = vpop.permute.xlu0 %605 }
 0x158   :  { %v538_v51 = vmul.f32 %v1504_v34, %v458_v45  ;;  %v614_v14 = vadd.f32 %v1615_v9, %v534_v1  ;;  %v615_v49 = vadd.f32 %v1477_v52, %v535_v3  ;;  %v1748_v22 = vsub.f32 %v1579_v59, %v1622_v30  ;;  %v658_v62 = vpop.permute.xlu1 %657 }
 0x159   :  { %v648_v12 = vpack.c.bf16 %v621_v38, %v620_v48  ;;  %v617_v50 = vadd.f32 %v1625_v32, %v537_v44  ;;  %v622_v5 = vadd.f32 %v590_v24, %v542_v10  ;;  %v1749_v54 = vsub.f32 %v1588_v11, %v1622_v30  ;;  %v1181_v11 = vld [vmem:[#allocation2 + $0x8] sm:$0xff]   ;;  %v1182_v30 = vld [vmem:[#allocation2 + $0x10] sm:$0xff]  }
 0x15a   :  { %v466_v47 = vmul.f32 %v1189_v26, %v1748_v22  ;;  %v618_v57 = vadd.f32 %v1666_v4, %v538_v51  ;;  %v645_v34 = vpack.c.bf16 %v615_v49, %v614_v14  ;;  %v625_v52 = vadd.f32 %v602_v0, %v545_v16 }
 0x15b   :  { %v467_v36 = vmul.f32 %v1189_v26, %v1749_v54  ;;  %926 = vperm.xlu1 %1159, %v1404_v27   ;;  %v644_v61 = vpack.c.bf16 %v613_v53, %v612_v56  ;;  %v646_v7 = vpack.c.bf16 %v617_v50, %v616_v18  ;;  %v649_v41 = vpack.c.bf16 %v623_v31, %v622_v5  ;;  %v1183_v26 = vld [vmem:[#allocation2 + $0x18] sm:$0xff]  }
 0x15c   :  { %v546_v9 = vmul.f32 %v526_v13, %v466_v47  ;;  %v647_v59 = vpack.c.bf16 %v619_v25, %v618_v57  ;;  %v650_v32 = vpack.c.bf16 %v625_v52, %v624_v15  ;;  %v1750_v24 = vmov 3   ;;  %v1184_v13 = vld [vmem:[#allocation2 + $0x20] sm:$0xff]   ;;  %v662_v55 = vpop.permute.xlu1 %661 }
 0x15d   :  { %v547_v21 = vmul.f32 %v530_v63, %v467_v36  ;;  %1088 = vmatprep.subr.bf16.mxu1 %v644_v61 }
 0x15e   :  { %v626_v8 = vadd.f32 %v606_v37, %v546_v9  ;;  %1089 = vmatpush3.bf16.msra.mxu1 %v644_v61 }
 0x15f   :  { %v627_v4 = vadd.f32 %v610_v23, %v547_v21  ;;  %1160 = vset.pattern.permute.xlu1 %v1750_v24  ;;  %1090 = vmatprep.subr.bf16.mxu1 %v645_v34 }
 0x160   :  { %713 = vperm.xlu1 %1160, %v1410_v28   ;;  %v670_v6 = vpop.permute.xlu1 %669 }
 0x161   :  { %v651_v27 = vpack.c.bf16 %v627_v4, %v626_v8 }
 0x162   :  { %1091 = vmatpush3.bf16.msra.mxu1 %v645_v34 }
 0x163   :  { %1092 = vmatprep.subr.bf16.mxu1 %v646_v7 }
 0x164   :  { %1162 = vset.pattern.permute.xlu1 %v1747_v20 }
 0x165   :  { %934 = vperm.xlu1 %1162, %v1416_v29   ;;  %v1185_v29 = vld [vmem:[#allocation2 + $0x28] sm:$0xff]  }
 0x166   :  { %1093 = vmatpush3.bf16.msra.mxu1 %v646_v7 }
 0x167   :  { %1094 = vmatprep.subr.bf16.mxu1 %v647_v59 }
 0x169   :  { %938 = vperm.xlu1 %1162, %v1410_v28   ;;  %v1187_v28 = vld [vmem:[#allocation2 + $0x38] sm:$0xff]  }
 0x16a   :  { %1095 = vmatpush3.bf16.msra.mxu1 %v647_v59 }
 0x16b   :  { %1096 = vmatprep.subr.bf16.mxu1 %v648_v12 }
 0x16e   :  { %1097 = vmatpush3.bf16.msra.mxu1 %v648_v12 }
 0x16f   :  { %1098 = vmatprep.subr.bf16.mxu1 %v649_v41 }
 0x172   :  { %1099 = vmatpush3.bf16.msra.mxu1 %v649_v41 }
 0x173   :  { %1100 = vmatprep.subr.bf16.mxu1 %v650_v32 }
 0x176   :  { %1101 = vmatpush3.bf16.msra.mxu1 %v650_v32 }
 0x177   :  { %1102 = vmatprep.subr.bf16.mxu1 %v651_v27 }
 0x17a   :  { %1103 = vmatpush3.bf16.msra.mxu1 %v651_v27 }
 0x17d   :  { %1105 = vmatmul.mubr.bf16.vlgmr.msra.gmra.mrb[0].mxu1 %v1181_v11 }
 0x17e   :  { %1108 = vmatprep.mubr.bf16.mxu1 %v1182_v30 }
 0x185   :  { %1109 = vmatmul.mubr.bf16.gmra.mrb[4].mxu1 %v1183_v26 }
 0x186   :  { %1112 = vmatprep.mubr.bf16.mxu1 %v1184_v13 }
 0x18d   :  { %1113 = vmatmul.mubr.bf16.gmra.mrb[8].mxu1 %v1185_v29 }
 0x18e   :  { %1116 = vmatprep.mubr.bf16.mxu1 %v1186_v17 }
 0x194   :  { %v883_v39 = vpop.permute.xlu1 %882  ;;  %v879_v25 = vpop.permute.xlu0 %878 }
 0x195   :  { %1117 = vmatmul.mubr.bf16.gmra.mrb[12].mxu1 %v1187_v28 }
 0x198   :  { %v887_v19 = vpop.permute.xlu1 %886  ;;  %v895_v42 = vpop.permute.xlu0 %894 }
 0x19c   :  { %v891_v58 = vpop.permute.xlu1 %890  ;;  %v907_v48 = vpop.permute.xlu0 %906 }
 0x1a0   :  { %v1715_v40 = vpop.permute.xlu0 %918 }
 0x1a1   :  { %v678_v33 = vpop.permute.xlu1 %677 }
 0x1a5   :  { %v682_v10 = vpop.permute.xlu1 %681  ;;  %v654_v63 = vpop.permute.xlu0 %653 }
 0x1a9   :  { %v666_v2 = vpop.permute.xlu0 %665 }
 0x1aa   :  { %v899_v35 = vpop.permute.xlu1 %898 }
 0x1ad   :  { %v674_v51 = vpop.permute.xlu0 %673 }
 0x1ae   :  { %v903_v56 = vpop.permute.xlu1 %902 }
 0x1b1   :  { %v686_v61 = vpop.permute.xlu0 %685 }
 0x1b3   :  { %v690_v18 = vpop.permute.xlu1 %689 }
 0x1b5   :  { %v698_v17 = vpop.permute.xlu0 %697 }
 0x1b7   :  { %v694_v0 = vpop.permute.xlu1 %693 }
 0x1bc   :  { %v911_v53 = vpop.permute.xlu1 %910 }
 0x1c0   :  { %v1717_v46 = vpop.permute.xlu1 %914 }
 0x1c5   :  { %v1719_v20 = vpop.permute.xlu1 %701 }
 0x1c9   :  { %v1721_v31 = vpop.permute.xlu1 %705 }
 0x1d6   :  { %v923_v5 = vpop.permute.xlu1 %922 }
 0x1da   :  { %v927_v27 = vpop.permute.xlu1 %926 }
 0x250   :  { %v1106_v43 = vpop.f32.mrb[0].mxu1 }
 0x251   :  { %v798_v60 = vpop.f32.mrb[1].mxu1  ;;  %v807_v45 = vadd.f32 %v1106_v43, %v662_v55 }
 0x252   :  { %v799_v1 = vadd.f32 %v798_v60, %v654_v63  ;;  %v1107_v3 = vpop.f32.mrb[2].mxu1  ;;  %v714_v63 = vpop.permute.xlu1 %713 }
 0x253   :  { %v810_v15 = vadd.f32 %v1107_v3, %v666_v2  ;;  %v801_v38 = vpop.f32.mrb[3].mxu1  ;;  %v863_v14 = vmax.f32 %v807_v45, 0.0 }
 0x254   :  { %v861_v44 = vmax.f32 %v799_v1, 0.0  ;;  %v802_v16 = vadd.f32 %v801_v38, %v658_v62 }
 0x255   :  { %v864_v12 = vmax.f32 %v810_v15, 0.0  ;;  %v943_v54 = vmul.f32 %v887_v19, %v863_v14  ;;  %v710_v15 = vpop.permute.xlu0 %709 }
 0x256   :  { %v862_v49 = vmax.f32 %v802_v16, 0.0  ;;  %v941_v22 = vmul.f32 %v879_v25, %v861_v44  ;;  %v935_v14 = vpop.permute.xlu1 %934 }
 0x257   :  { %v944_v52 = vmul.f32 %v891_v58, %v864_v12 }
 0x258   :  { %v942_v47 = vmul.f32 %v883_v39, %v862_v49  ;;  %v1110_v50 = vpop.f32.mrb[4].mxu1 }
 0x259   :  { %v814_v57 = vpop.f32.mrb[5].mxu1  ;;  %v823_v37 = vadd.f32 %v1110_v50, %v678_v33  ;;  %v931_v50 = vpop.permute.xlu0 %930 }
 0x25a   :  { %v957_v36 = vadd.f32 %v942_v47, %v941_v22  ;;  %v815_v34 = vadd.f32 %v814_v57, %v670_v6  ;;  %v1111_v9 = vpop.f32.mrb[6].mxu1 }
 0x25b   :  { %v817_v23 = vpop.f32.mrb[7].mxu1  ;;  %v826_v41 = vadd.f32 %v1111_v9, %v682_v10  ;;  %v867_v32 = vmax.f32 %v823_v37, 0.0  ;;  %v939_v9 = vpop.permute.xlu1 %938 }
 0x25c   :  { %v958_v7 = vadd.f32 %v957_v36, %v943_v54  ;;  %v865_v59 = vmax.f32 %v815_v34, 0.0  ;;  %v818_v21 = vadd.f32 %v817_v23, %v674_v51 }
 0x25d   :  { %v868_v30 = vmax.f32 %v826_v41, 0.0  ;;  %v947_v28 = vmul.f32 %v903_v56, %v867_v32 }
 0x25e   :  { %v945_v8 = vmul.f32 %v895_v42, %v865_v59  ;;  %v959_v4 = vadd.f32 %v958_v7, %v944_v52  ;;  %v866_v24 = vmax.f32 %v818_v21, 0.0 }
 0x25f   :  { %v948_v33 = vmul.f32 %v907_v48, %v868_v30 }
 0x260   :  { %v960_v11 = vadd.f32 %v959_v4, %v945_v8  ;;  %v946_v26 = vmul.f32 %v899_v35, %v866_v24  ;;  %v1114_v13 = vpop.f32.mrb[8].mxu1 }
 0x261   :  { %v830_v29 = vpop.f32.mrb[9].mxu1  ;;  %v839_v55 = vadd.f32 %v1114_v13, %v694_v0 }
 0x262   :  { %v961_v62 = vadd.f32 %v960_v11, %v946_v26  ;;  %v831_v6 = vadd.f32 %v830_v29, %v686_v61  ;;  %v1115_v39 = vpop.f32.mrb[10].mxu1 }
 0x263   :  { %v842_v19 = vadd.f32 %v1115_v39, %v698_v17  ;;  %v833_v58 = vpop.f32.mrb[11].mxu1  ;;  %v871_v2 = vmax.f32 %v839_v55, 0.0 }
 0x264   :  { %v962_v10 = vadd.f32 %v961_v62, %v947_v28  ;;  %v869_v25 = vmax.f32 %v831_v6, 0.0  ;;  %v834_v42 = vadd.f32 %v833_v58, %v690_v18 }
 0x265   :  { %v872_v35 = vmax.f32 %v842_v19, 0.0  ;;  %v951_v38 = vmul.f32 %v1715_v40, %v871_v2 }
 0x266   :  { %v949_v43 = vmul.f32 %v911_v53, %v869_v25  ;;  %v963_v60 = vadd.f32 %v962_v10, %v948_v33  ;;  %v870_v45 = vmax.f32 %v834_v42, 0.0 }
 0x267   :  { %v952_v18 = vmul.f32 %v923_v5, %v872_v35 }
 0x268   :  { %v964_v1 = vadd.f32 %v963_v60, %v949_v43  ;;  %v950_v3 = vmul.f32 %v1717_v46, %v870_v45  ;;  %v1118_v56 = vpop.f32.mrb[12].mxu1 }
 0x269   :  { %v846_v0 = vpop.f32.mrb[13].mxu1  ;;  %v855_v16 = vadd.f32 %v1118_v56, %v710_v15 }
 0x26a   :  { %v965_v44 = vadd.f32 %v964_v1, %v950_v3  ;;  %v847_v48 = vadd.f32 %v846_v0, %v1719_v20  ;;  %v1119_v51 = vpop.f32.mrb[14].mxu1 }
 0x26b   :  { %v849_v49 = vpop.f32.mrb[15].mxu1  ;;  %v858_v22 = vadd.f32 %v1119_v51, %v714_v63  ;;  %v875_v46 = vmax.f32 %v855_v16, 0.0 }
 0x26c   :  { %v966_v53 = vadd.f32 %v965_v44, %v951_v38  ;;  %v873_v12 = vmax.f32 %v847_v48, 0.0  ;;  %v850_v47 = vadd.f32 %v849_v49, %v1721_v31  ;;  %v981_v31 = vpop.permute.xlu0 %980 }
 0x26d   :  { %v876_v37 = vmax.f32 %v858_v22, 0.0  ;;  %v955_v52 = vmul.f32 %v935_v14, %v875_v46 }
 0x26e   :  { %v953_v57 = vmul.f32 %v927_v27, %v873_v12  ;;  %v874_v54 = vmax.f32 %v850_v47, 0.0  ;;  %v967_v36 = vadd.f32 %v966_v53, %v952_v18 }
 0x26f   :  { %v956_v23 = vmul.f32 %v939_v9, %v876_v37 }
 0x270   :  { %v954_v40 = vmul.f32 %v931_v50, %v874_v54  ;;  %v968_v34 = vadd.f32 %v967_v36, %v953_v57 }
 0x272   :  { %v969_v20 = vadd.f32 %v968_v34, %v954_v40 }
 0x274   :  { %v970_v5 = vadd.f32 %v969_v20, %v955_v52 }
 0x276   :  { %v971_v61 = vadd.f32 %v970_v5, %v956_v23 }
 0x278   :  { %v972_v7 = vrot.slane %v971_v61, 4 }
 0x27a   :  { %v973_v59 = vadd.f32 %v972_v7, %v971_v61 }
 0x27c   :  { %v974_v41 = vrot.slane %v973_v59, 2 }
 0x27e   :  { %v975_v21 = vadd.f32 %v974_v41, %v973_v59 }
 0x280   :  { %v976_v32 = vrot.slane %v975_v21, 1 }
 0x282   :  { %v977_v8 = vadd.f32 %v976_v32, %v975_v21 }
 0x284   :  { %v983_v4 = vadd.f32 %v981_v31, %v977_v8 }
 0x286   :  { %984 = vst [vmem:[#allocation5] sm:$0x1] %v983_v4 }
 0x287   :  { %1223 = shalt.err (!%p1220_p12)
}
 0x288   :  { %s1224_s16 = scalar_lea.hbm %s1743_s4, 16 }
 0x289   :  { %p1225_p13 = scmp.ne.s32.totalorder %s1743_s4, %s1224_s16  ;;  %p1228_p0 = scmp.lt.u32.totalorder %s1224_s16, %s1743_s4 }
 0x28b   :  { %p1230_p1 = pnand %p1228_p0, %p1225_p13 }
 0x28d   :  { %1233 = shalt.err (!%p1230_p1)
}
 0x28e   :  { %994 = dma.vmem_to_hbm [thread:$0]  %s992_s11, 16, %s1743_s4, [#allocation4]  }
 0x28f   :  { %1236 = dma.done.wait [#allocation4], 16  }
 0x290   :  { %1237 = vsyncadd [#allocation4], 4294967280 }
 0x291   :  { %998 = vsyncpa [#allocation3], 1 }
 0x292   :  { %999 = vsyncpa [#allocation4], 1 }

</bundles_post_ra>
